<compile_context>
chip_gen: v7x
topology: tpu7x:2x2x1
jax: 0.10.0
libtpu: 0.0.40
codegen_flags: <defaults>
</compile_context>

<pallas_src>
import jax
import jax.numpy as jnp
from jax.experimental import pallas as pl
from jax.experimental.pallas import tpu as pltpu


def _round_up(x: int, m: int) -> int:
    return ((x + m - 1) // m) * m


def _normalize_kernel(img_ref, scale_ref, bias_ref, out_ref):
    """out = img * scale + bias for one (tm, tl) tile.

    img_ref/out_ref: (tm, tl); scale_ref/bias_ref: (tm, 1) per-row values,
    broadcast across the lane dimension in-register.
    """
    out_ref[...] = img_ref[...] * scale_ref[...] + bias_ref[...]


def _normalize_2d(img2d, scale_rows, bias_rows):
    """img2d: (R, L); scale_rows/bias_rows: (R,) per-row scale/bias (f32)."""
    R, L = img2d.shape
    dtype = img2d.dtype

    # dtype-aware sublane granularity: f32 -> 8 rows, bf16 -> 16, int8 -> 32.
    sublane = {4: 8, 2: 16, 1: 32}.get(jnp.dtype(dtype).itemsize, 8)

    # Tiles: multiples of (sublane, 128), capped at (512, 4096).
    # f32: 512*4096*4 B = 8 MiB per buffer; double-buffered in+out ~= 32 MiB.
    tm = min(_round_up(R, sublane), 512)
    tl = min(_round_up(L, 128), 4096)

    scale2 = scale_rows.reshape(R, 1).astype(dtype)
    bias2 = bias_rows.reshape(R, 1).astype(dtype)

    grid = (pl.cdiv(R, tm), pl.cdiv(L, tl))

    return pl.pallas_call(
        _normalize_kernel,
        out_shape=jax.ShapeDtypeStruct((R, L), dtype),
        grid=grid,
        in_specs=[
            pl.BlockSpec((tm, tl), lambda i, j: (i, j)),   # image tile
            pl.BlockSpec((tm, 1), lambda i, j: (i, 0)),    # per-row scale
            pl.BlockSpec((tm, 1), lambda i, j: (i, 0)),    # per-row bias
        ],
        out_specs=pl.BlockSpec((tm, tl), lambda i, j: (i, j)),
        compiler_params=pltpu.CompilerParams(
            dimension_semantics=("parallel", "parallel"),
            vmem_limit_bytes=48 << 20,
        ),
    )(img2d, scale2, bias2)


def normalize(img, mean, std):
    """JAX/Pallas equivalent of Normalization.forward: (img - mean) / std.

    img: (N, C, H, W) or (C, H, W); mean/std: per-channel, any shape that
    flattens to (C,) (e.g. (C,), (C, 1, 1)).
    """
    squeeze_batch = False
    if img.ndim == 3:  # (C, H, W) -> (1, C, H, W)
        img = img[None]
        squeeze_batch = True
    assert img.ndim == 4, "expected NCHW (or CHW) input"

    N, C, H, W = img.shape
    mean_c = jnp.asarray(mean, jnp.float32).reshape(-1)
    std_c = jnp.asarray(std, jnp.float32).reshape(-1)
    assert mean_c.shape == (C,) and std_c.shape == (C,)

    # Fold (img - mean) / std into img * scale + bias, computed once in f32.
    scale_c = 1.0 / std_c        # (C,)
    bias_c = -mean_c * scale_c   # (C,)

    # Row r of the (N*C, H*W) slab corresponds to channel r % C.
    scale_rows = jnp.tile(scale_c, N)   # (N*C,)
    bias_rows = jnp.tile(bias_c, N)     # (N*C,)

    img2d = img.reshape(N * C, H * W)
    out2d = _normalize_2d(img2d, scale_rows, bias_rows)
    out = out2d.reshape(N, C, H, W)
    if squeeze_batch:
        out = out[0]
    return out


class Normalization:
    """JAX/Pallas equivalent of the PyTorch Normalization module."""

    def __init__(self, mean, std):
        self.mean = jnp.asarray(mean, dtype=jnp.float32).reshape(-1, 1, 1)
        self.std = jnp.asarray(std, dtype=jnp.float32).reshape(-1, 1, 1)

    def __call__(self, img):
        return normalize(img, self.mean, self.std)


def _reference(img, mean, std):
    m = jnp.asarray(mean, jnp.float32).reshape(-1, 1, 1)
    s = jnp.asarray(std, jnp.float32).reshape(-1, 1, 1)
    return (img - m) / s


if __name__ == "__main__":
    key = jax.random.PRNGKey(0)
    k0, k1 = jax.random.split(key)

    # NCHW, matching PyTorch conv-feature conventions: batch=2, channels=4,
    # spatial 16x16 (ImageNet-style per-channel mean/std, extended to 4 ch).
    x = jax.random.normal(k0, (2, 4, 16, 16), dtype=jnp.float32)
    mean4 = [0.485, 0.456, 0.406, 0.450]
    std4 = [0.229, 0.224, 0.225, 0.250]

    module = Normalization(mean4, std4)
    out = jax.block_until_ready(module(x))
    ref = _reference(x, mean4, std4)
    assert out.shape == x.shape
    # scale/bias folding differs from (x-m)/s by a few f32 ulps at most.
    assert jnp.allclose(out, ref, rtol=1e-5, atol=2e-6), float(
        jnp.max(jnp.abs(out - ref)))

    # CHW path with non-(8,128)-aligned rows/lanes: exercises the ragged
    # edge-block path (no pad / crop, direct write into the (R, L) output).
    x3 = jax.random.normal(k1, (3, 10, 10), dtype=jnp.float32)
    mean3 = [0.485, 0.456, 0.406]
    std3 = [0.229, 0.224, 0.225]
    module3 = Normalization(mean3, std3)
    out3 = jax.block_until_ready(module3(x3))
    ref3 = _reference(x3, mean3, std3)
    assert out3.shape == x3.shape
    assert jnp.allclose(out3, ref3, rtol=1e-5, atol=2e-6), float(
        jnp.max(jnp.abs(out3 - ref3)))

    print("KERNEL_OK")
</pallas_src>

<mosaic_0001>
module attributes {stable_mosaic.version = 11 : i64} {
  func.func @_normalize_kernel(%arg0: i32, %arg1: i32, %arg2: memref<8x256xf32, #tpu.memory_space<vmem>>, %arg3: memref<8x1xf32, #tpu.memory_space<vmem>>, %arg4: memref<8x1xf32, #tpu.memory_space<vmem>>, %arg5: memref<8x256xf32, #tpu.memory_space<vmem>>) attributes {dimension_semantics = [#tpu.dimension_semantics<parallel>, #tpu.dimension_semantics<parallel>], iteration_bounds = array<i64: 1, 1>, scalar_prefetch = 0 : i64, scratch_operands = 0 : i64, tpu.core_type = #tpu.core_type<tc>, window_params = [{transform_indices = @transform_0, window_bounds = array<i64: 8, 256>}, {transform_indices = @transform_1, window_bounds = array<i64: 8, 1>}, {transform_indices = @transform_2, window_bounds = array<i64: 8, 1>}, {transform_indices = @transform_3, window_bounds = array<i64: 8, 256>}]} {
    %c0 = arith.constant 0 : index
    %c0_0 = arith.constant 0 : index
    %0 = vector.load %arg2[%c0, %c0_0] : memref<8x256xf32, #tpu.memory_space<vmem>>, vector<8x256xf32>
    %c0_1 = arith.constant 0 : index
    %c0_2 = arith.constant 0 : index
    %1 = vector.load %arg3[%c0_1, %c0_2] : memref<8x1xf32, #tpu.memory_space<vmem>>, vector<8x1xf32>
    %2 = vector.broadcast %1 : vector<8x1xf32> to vector<8x256xf32>
    %3 = arith.mulf %0, %2 : vector<8x256xf32>
    %c0_3 = arith.constant 0 : index
    %c0_4 = arith.constant 0 : index
    %4 = vector.load %arg4[%c0_3, %c0_4] : memref<8x1xf32, #tpu.memory_space<vmem>>, vector<8x1xf32>
    %5 = vector.broadcast %4 : vector<8x1xf32> to vector<8x256xf32>
    %6 = arith.addf %3, %5 : vector<8x256xf32>
    %c0_5 = arith.constant 0 : index
    %c0_6 = arith.constant 0 : index
    %7 = vector.load %arg5[%c0_5, %c0_6] : memref<8x256xf32, #tpu.memory_space<vmem>>, vector<8x256xf32>
    tpu.vector_store %arg5[%c0_5, %c0_6], %6 {strides = array<i32>} : memref<8x256xf32, #tpu.memory_space<vmem>>, vector<8x256xf32>,
    return
  }
  func.func @transform_0(%arg0: i32, %arg1: i32) -> (i32, i32) {
    %c0_i32 = arith.constant 0 : i32
    return %arg0, %arg1 : i32, i32
  }
  func.func @transform_1(%arg0: i32, %arg1: i32) -> (i32, i32) {
    %c0_i32 = arith.constant 0 : i32
    %c0_i32_0 = arith.constant 0 : i32
    return %arg0, %c0_i32 : i32, i32
  }
  func.func @transform_2(%arg0: i32, %arg1: i32) -> (i32, i32) {
    %c0_i32 = arith.constant 0 : i32
    %c0_i32_0 = arith.constant 0 : i32
    return %arg0, %c0_i32 : i32, i32
  }
  func.func @transform_3(%arg0: i32, %arg1: i32) -> (i32, i32) {
    %c0_i32 = arith.constant 0 : i32
    return %arg0, %arg1 : i32, i32
  }
}

</mosaic_0001>

<bundles_post_ra>
// kernel: tpu_custom_call.1
= control target key start
LH: loop header
LB: loop body
LE: loop exit
PB: predicated region body
PF: predicated region fallthrough
CT: control target
= control target key end

     0   :  { %s122_s0 = inlined_call_operand.vmem [shape: f32[8,256], index: 0, kind: input, shape index: {}]   ;;  %s123_s1 = inlined_call_operand.vmem [shape: f32[8,1], index: 1, kind: input, shape index: {}]   ;;  %s124_s2 = inlined_call_operand.vmem [shape: f32[8,1], index: 2, kind: input, shape index: {}]   ;;  %s125_s3 = inlined_call_operand.hbm [shape: f32[8,256], index: 3, kind: output, shape index: {}]  }
   0x1   :  { %v17_v0 = vld [vmem:[%s123_s1] sm:$0xff] }
   0x2   :  { %8 = vsyncpa [#allocation3], 0  ;;  %v76_v1 = vmov 0   ;;  %v25_v2 = vld [vmem:[%s124_s2] sm:$0xff]  ;;  %v16_v5 = vld [vmem:[%s122_s0 + $0x8] sm:$0xff]  ;;  %s77_s20 = smov [#allocation2]  }
   0x3   :  { %51 = vset.pattern.permute.xlu0 %v76_v1  ;;  %v15_v4 = vld [vmem:[%s122_s0] sm:$0xff]  ;;  %s41_s1 = sshll.u32 %s77_s20, 4  ;;  %s42_s1 = int_to_ptr.vmem [resolvable:$true] %s41_s1 }
   0x4   :  { %20 = vperm.xlu0 %51, %v17_v0   ;;  %s52_s2 = scalar_lea.vmem %s42_s1, 256  ;;  %p57_p1 = scmp.lt.s32.totalorder %s42_s1, %s42_s1 }
   0x5   :  { %p53_p0 = scmp.ne.s32.totalorder %s42_s1, %s52_s2  ;;  %p58_p2 = scmp.lt.s32.totalorder %s52_s2, %s52_s2 }
   0x7   :  { %p59_p3 = por %p58_p2, %p57_p1 }
   0x8   :  { %28 = vperm.xlu0 %51, %v25_v2  }
   0x9   :  { %p60_p4 = pnand %p59_p3, %p53_p0 }
  0x83   :  { %v21_v3 = vpop.permute.xlu0 %20 }
  0x84   :  { %v23_v6 = vmul.f32 %v21_v3, %v15_v4  ;;  %v24_v7 = vmul.f32 %v21_v3, %v16_v5 }
  0x87   :  { %v29_v8 = vpop.permute.xlu0 %28 }
  0x88   :  { %v31_v9 = vadd.f32 %v29_v8, %v23_v6  ;;  %v32_v10 = vadd.f32 %v29_v8, %v24_v7 }
  0x8a   :  { %33 = vst [vmem:[#allocation2] sm:$0xff] %v31_v9  ;;  %34 = vst [vmem:[#allocation2 + $0x8] sm:$0xff] %v32_v10 }
  0x8b   :  { %63 = shalt.err (!%p60_p4)
}
  0x8c   :  { %s64_s0 = scalar_lea.hbm %s125_s3, 256 }
  0x8d   :  { %p65_p5 = scmp.ne.s32.totalorder %s125_s3, %s64_s0  ;;  %p68_p6 = scmp.lt.u32.totalorder %s64_s0, %s125_s3 }
  0x8f   :  { %p70_p7 = pnand %p68_p6, %p65_p5 }
  0x91   :  { %73 = shalt.err (!%p70_p7)
}
  0x92   :  { %44 = dma.vmem_to_hbm [thread:$0]  %s42_s1, 256, %s125_s3, [#allocation3]  }
  0x93   :  { %74 = dma.done.wait [#allocation3], 256  }
  0x94   :  { %75 = vsyncadd [#allocation3], 4294967040 }
  0x95   :  { %48 = vsyncpa [#allocation3], 1 }

</bundles_post_ra>
